<compile_context>
chip_gen: v7x
topology: tpu7x:2x2x1
jax: 0.10.0
libtpu: 0.0.40
codegen_flags: <defaults>
</compile_context>

<pallas_src>
import functools

import jax
import jax.numpy as jnp
from jax import lax
from jax.experimental import pallas as pl
from jax.experimental.pallas import tpu as pltpu


def _round_up(x, m):
    return ((x + m - 1) // m) * m


def _pick_tk(K, target):
    """Largest K-tile <= target that exactly divides K and is a multiple of 128.

    Guarantees the contraction axis is always fully covered (no garbage lanes
    feeding the dot product).  Falls back to full K (no K tiling).
    """
    if K <= target:
        return K
    t = (min(target, K) // 128) * 128
    while t >= 128:
        if K % t == 0:
            return t
        t -= 128
    return K


def _dot_pt_layout(xv, wv, precision):
    """x:(tm,tk) @ w:(tn,tk)^T without materializing a transpose."""
    if xv.dtype != wv.dtype:
        ct = jnp.promote_types(xv.dtype, wv.dtype)
        xv = xv.astype(ct)
        wv = wv.astype(ct)
    return lax.dot_general(
        xv, wv,
        dimension_numbers=(((1,), (1,)), ((), ())),
        preferred_element_type=jnp.float32,
        precision=precision,
    )


def _gen_kernel_fullk(x_ref, w_ref, b_ref, o_ref, *, precision):
    # Single-K-block path: no accumulator scratch needed.
    acc = _dot_pt_layout(x_ref[...], w_ref[...], precision)
    o_ref[...] = (acc + b_ref[...].astype(jnp.float32)).astype(o_ref.dtype)


def _gen_kernel_ktiled(x_ref, w_ref, b_ref, o_ref, acc_ref, *, nk, precision):
    k = pl.program_id(2)

    @pl.when(k == 0)
    def _():
        acc_ref[...] = jnp.zeros_like(acc_ref)

    acc_ref[...] += _dot_pt_layout(x_ref[...], w_ref[...], precision)

    @pl.when(k == nk - 1)
    def _():
        o_ref[...] = (acc_ref[...] + b_ref[...].astype(jnp.float32)).astype(o_ref.dtype)


def generator_forward(x, weight, bias, *, tm=256, tn=512, tk=2048,
                      out_dtype=None, precision=None):
    """Pallas equivalent of nn.Linear(d_model, vocab)(x).

    x:      (batch, seq, d_model)
    weight: (vocab, d_model)   PyTorch layout, streamed as stored (no wrapper cast).
            For a bf16 fast path, keep the weights in bf16 in HBM upstream.
    bias:   (vocab,)
    out_dtype: logits dtype (default x.dtype; bf16 halves the output stream).
    precision: lax.Precision for the MXU (None = JAX default).
    returns (batch, seq, vocab)
    """
    batch, seq, d_model = x.shape
    vocab, k_dim = weight.shape
    assert k_dim == d_model, "weight must be (vocab, d_model)"
    M = batch * seq
    out_dtype = x.dtype if out_dtype is None else out_dtype

    x2d = x.reshape(M, d_model)          # free (contiguous)
    b2d = bias.reshape(1, vocab)         # free

    isz = lambda a: jnp.dtype(a.dtype).itemsize
    out_isz = jnp.dtype(out_dtype).itemsize

    # ---- tile sizes (sublane granularity follows narrowest streamed dtype) --
    min_bytes = min(isz(x2d), isz(weight))
    sub = {4: 8, 2: 16, 1: 32}.get(min_bytes, 8)
    tm_eff = max(sub, min(_round_up(tm, sub), _round_up(M, sub)))
    tn_eff = max(128, min(_round_up(tn, 128), _round_up(vocab, 128)))
    tk_eff = _pick_tk(d_model, tk)

    n_i = pl.cdiv(M, tm_eff)        # tiles along tokens
    n_j = pl.cdiv(vocab, tn_eff)    # tiles along vocab
    nk = d_model // tk_eff          # tk_eff divides d_model by construction

    # ---- stationarity: compare the bytes each order would re-stream --------
    x_total = M * d_model * isz(x2d)
    w_total = vocab * d_model * isz(weight)
    weight_stationary = (x_total * n_j) < (w_total * n_i)

    # ---- grid / index maps --------------------------------------------------
    if nk == 1:
        if weight_stationary:
            grid = (n_j, n_i)
            x_map = lambda j, i: (i, 0)
            w_map = lambda j, i: (j, 0)
            b_map = lambda j, i: (0, j)
            o_map = lambda j, i: (i, j)
        else:
            grid = (n_i, n_j)
            x_map = lambda i, j: (i, 0)
            w_map = lambda i, j: (j, 0)
            b_map = lambda i, j: (0, j)
            o_map = lambda i, j: (i, j)
        kernel = functools.partial(_gen_kernel_fullk, precision=precision)
        scratch = []
        dims = ("parallel", "arbitrary")   # only the stationary axis is sharded
    else:
        if weight_stationary:
            grid = (n_j, n_i, nk)
            x_map = lambda j, i, k: (i, k)
            w_map = lambda j, i, k: (j, k)
            b_map = lambda j, i, k: (0, j)
            o_map = lambda j, i, k: (i, j)
        else:
            grid = (n_i, n_j, nk)
            x_map = lambda i, j, k: (i, k)
            w_map = lambda i, j, k: (j, k)
            b_map = lambda i, j, k: (0, j)
            o_map = lambda i, j, k: (i, j)
        kernel = functools.partial(_gen_kernel_ktiled, nk=nk, precision=precision)
        scratch = [pltpu.VMEM((tm_eff, tn_eff), jnp.float32)]
        dims = ("parallel", "arbitrary", "arbitrary")

    # ---- VMEM budget (generation-aware ceiling with headroom) ---------------
    try:
        vmem_cap = pltpu.get_tpu_info().vmem_capacity_bytes
    except Exception:
        vmem_cap = 64 << 20            # v7x-safe fallback
    vmem_ceiling = int(vmem_cap * 3 // 4)   # ~48 MiB on v7x, ~96 MiB on v5e/v6e
    tile_bytes = (tm_eff * tk_eff * isz(x2d)
                  + tn_eff * tk_eff * isz(weight)
                  + tn_eff * isz(b2d)
                  + tm_eff * tn_eff * out_isz)
    acc_bytes = tm_eff * tn_eff * 4 if nk > 1 else 0
    vmem_limit = int(min(max(2 * tile_bytes + acc_bytes + (8 << 20), 32 << 20),
                         vmem_ceiling))

    # ---- cost estimate (includes the re-streamed operand) -------------------
    if nk > 1:
        x_stream, w_stream = x_total * n_j, w_total * n_i
    elif weight_stationary:
        x_stream, w_stream = x_total * n_j, w_total
    else:
        x_stream, w_stream = x_total, w_total * n_i
    cost = pl.CostEstimate(
        flops=2 * M * vocab * d_model,
        transcendentals=0,
        bytes_accessed=int(x_stream + w_stream + vocab * isz(b2d)
                           + M * vocab * out_isz),
    )

    out = pl.pallas_call(
        kernel,
        out_shape=jax.ShapeDtypeStruct((M, vocab), out_dtype),   # exact, no padding
        grid_spec=pltpu.PrefetchScalarGridSpec(
            num_scalar_prefetch=0,
            grid=grid,
            in_specs=[
                pl.BlockSpec((tm_eff, tk_eff), x_map),   # activations
                pl.BlockSpec((tn_eff, tk_eff), w_map),   # weight, PyTorch layout
                pl.BlockSpec((1, tn_eff), b_map),        # bias
            ],
            out_specs=pl.BlockSpec((tm_eff, tn_eff), o_map),
            scratch_shapes=scratch,
        ),
        compiler_params=pltpu.CompilerParams(
            dimension_semantics=dims,
            vmem_limit_bytes=vmem_limit,
        ),
        cost_estimate=cost,
    )(x2d, weight, b2d)

    return out.reshape(batch, seq, vocab)


def init_generator_params(key, d_model, vocab):
    """Deterministic init matching nn.Linear default (uniform +/- 1/sqrt(fan_in))."""
    kw, kb = jax.random.split(key)
    bound = 1.0 / (d_model ** 0.5)
    weight = jax.random.uniform(kw, (vocab, d_model), jnp.float32, -bound, bound)
    bias = jax.random.uniform(kb, (vocab,), jnp.float32, -bound, bound)
    return weight, bias


if __name__ == "__main__":
    # ---- test 1: small, tile-aligned LM-head shape --------------------------
    batch, seq, d_model, vocab = 2, 8, 32, 128
    key = jax.random.PRNGKey(0)
    kx, kp, kx2, kp2 = jax.random.split(key, 4)
    x = jax.random.normal(kx, (batch, seq, d_model), dtype=jnp.float32)
    weight, bias = init_generator_params(kp, d_model, vocab)
    y_ref = x @ weight.T + bias

    # default MXU precision (fast path) — bf16-pass tolerance.
    y = jax.block_until_ready(generator_forward(x, weight, bias))
    assert y.shape == (batch, seq, vocab)
    assert jnp.allclose(y, y_ref, atol=2e-2, rtol=2e-2)

    # full-f32 MXU precision — tight tolerance against the reference.
    y_hi = jax.block_until_ready(
        generator_forward(x, weight, bias, precision=lax.Precision.HIGHEST))
    assert jnp.allclose(y_hi, y_ref, atol=1e-5, rtol=1e-5)

    # bf16 logits output path (halves the writeback stream on big heads).
    y_bf16 = jax.block_until_ready(
        generator_forward(x, weight, bias, out_dtype=jnp.bfloat16,
                          precision=lax.Precision.HIGHEST))
    assert y_bf16.dtype == jnp.bfloat16
    assert jnp.allclose(y_bf16.astype(jnp.float32), y_ref, atol=5e-2, rtol=5e-2)

    # ---- test 2: unaligned M / vocab + K-tiled accumulator path -------------
    # (exercises masked edge blocks with NO wrapper padding, and nk > 1)
    b2_, s2_, d2_, v2_ = 2, 9, 256, 300     # M=18 (not /16), vocab=300 (not /128)
    x2 = jax.random.normal(kx2, (b2_, s2_, d2_), dtype=jnp.float32)
    w2, bi2 = init_generator_params(kp2, d2_, v2_)
    y2_ref = x2 @ w2.T + bi2
    y2 = jax.block_until_ready(
        generator_forward(x2, w2, bi2, tm=16, tn=128, tk=128,
                          precision=lax.Precision.HIGHEST))
    assert y2.shape == (b2_, s2_, v2_)
    assert jnp.allclose(y2, y2_ref, atol=1e-4, rtol=1e-4)

    print("KERNEL_OK")
</pallas_src>

<mosaic_0001>
module attributes {stable_mosaic.version = 11 : i64} {
  func.func @_gen_kernel_fullk(%arg0: i32, %arg1: i32, %arg2: memref<16x32xf32, #tpu.memory_space<vmem>>, %arg3: memref<128x32xf32, #tpu.memory_space<vmem>>, %arg4: memref<1x128xf32, #tpu.memory_space<vmem>>, %arg5: memref<16x128xf32, #tpu.memory_space<vmem>>) attributes {dimension_semantics = [#tpu.dimension_semantics<parallel>, #tpu.dimension_semantics<arbitrary>], iteration_bounds = array<i64: 1, 1>, scalar_prefetch = 0 : i64, scratch_operands = 0 : i64, tpu.core_type = #tpu.core_type<tc>, window_params = [{transform_indices = @transform_0, window_bounds = array<i64: 16, 32>}, {transform_indices = @transform_1, window_bounds = array<i64: 128, 32>}, {transform_indices = @transform_2, window_bounds = array<i64: 1, 128>}, {transform_indices = @transform_3, window_bounds = array<i64: 16, 128>}]} {
    %c0 = arith.constant 0 : index
    %c0_0 = arith.constant 0 : index
    %0 = vector.load %arg2[%c0, %c0_0] : memref<16x32xf32, #tpu.memory_space<vmem>>, vector<16x32xf32>
    %c0_1 = arith.constant 0 : index
    %c0_2 = arith.constant 0 : index
    %1 = vector.load %arg3[%c0_1, %c0_2] : memref<128x32xf32, #tpu.memory_space<vmem>>, vector<128x32xf32>
    %cst = arith.constant dense<0.000000e+00> : vector<16x128xf32>
    %2 = tpu.matmul %0, %1, %cst {dimension_numbers = #tpu.dot_dimension_numbers<[1], [1], [0], [0], [0, 0, 1, 0], [], []>} : vector<16x32xf32>, vector<128x32xf32>, vector<16x128xf32> -> vector<16x128xf32>
    %c0_3 = arith.constant 0 : index
    %c0_4 = arith.constant 0 : index
    %3 = vector.load %arg4[%c0_3, %c0_4] : memref<1x128xf32, #tpu.memory_space<vmem>>, vector<1x128xf32>
    %4 = vector.broadcast %3 : vector<1x128xf32> to vector<16x128xf32>
    %5 = arith.addf %2, %4 : vector<16x128xf32>
    %c0_5 = arith.constant 0 : index
    %c0_6 = arith.constant 0 : index
    %6 = vector.load %arg5[%c0_5, %c0_6] : memref<16x128xf32, #tpu.memory_space<vmem>>, vector<16x128xf32>
    tpu.vector_store %arg5[%c0_5, %c0_6], %5 {strides = array<i32>} : memref<16x128xf32, #tpu.memory_space<vmem>>, vector<16x128xf32>,
    return
  }
  func.func @transform_0(%arg0: i32, %arg1: i32) -> (i32, i32) {
    %c0_i32 = arith.constant 0 : i32
    %c0_i32_0 = arith.constant 0 : i32
    return %arg1, %c0_i32 : i32, i32
  }
  func.func @transform_1(%arg0: i32, %arg1: i32) -> (i32, i32) {
    %c0_i32 = arith.constant 0 : i32
    %c0_i32_0 = arith.constant 0 : i32
    return %arg0, %c0_i32 : i32, i32
  }
  func.func @transform_2(%arg0: i32, %arg1: i32) -> (i32, i32) {
    %c0_i32 = arith.constant 0 : i32
    %c0_i32_0 = arith.constant 0 : i32
    return %c0_i32, %arg0 : i32, i32
  }
  func.func @transform_3(%arg0: i32, %arg1: i32) -> (i32, i32) {
    %c0_i32 = arith.constant 0 : i32
    return %arg1, %arg0 : i32, i32
  }
}

</mosaic_0001>

<bundles_post_ra>
// kernel: tpu_custom_call.1
= control target key start
LH: loop header
LB: loop body
LE: loop exit
PB: predicated region body
PF: predicated region fallthrough
CT: control target
= control target key end

     0   :  { %vm40_vm0 = vcmask 261120   ;;  %s467_s0 = inlined_call_operand.vmem [shape: f32[16,32], index: 0, kind: input, shape index: {}]   ;;  %s468_s1 = inlined_call_operand.vmem [shape: f32[128,32], index: 1, kind: input, shape index: {}]   ;;  %s469_s2 = inlined_call_operand.vmem [shape: f32[1,128], index: 2, kind: input, shape index: {}]   ;;  %s470_s3 = inlined_call_operand.hbm [shape: f32[16,128], index: 3, kind: output, shape index: {}]  }
   0x1   :  { %v17_v0 = vld [vmem:[%s468_s1] sm:$0xff]  ;;  %v18_v1 = vld [vmem:[%s468_s1 + $0x8] sm:$0xff]  ;;  %v19_v2 = vld [vmem:[%s468_s1 + $0x10] sm:$0xff] }
   0x2   :  { %v260_v3 = vpack.c.bf16 %v18_v1, %v17_v0  ;;  %vm369_vm1 = vmpackc.low %vm40_vm0, %vm40_vm0  ;;  %v20_v5 = vld [vmem:[%s468_s1 + $0x18] sm:$0xff]  ;;  %v15_v7 = vld [vmem:[%s467_s0] sm:$0xff] }
   0x3   :  { %v266_v6 = vpack.c.bf16 %v20_v5, %v19_v2  ;;  %v21_v8 = vld [vmem:[%s468_s1 + $0x20] sm:$0xff]  ;;  %v22_v9 = vld [vmem:[%s468_s1 + $0x28] sm:$0xff]  ;;  %257 = vmatprep.mubr.msk.f32.mxu0 %vm40_vm0, %v15_v7 }
   0x4   :  { %262 = vmatprep.subr.msk.bf16.mxu0 %vm369_vm1, %v260_v3 }
   0x5   :  { %265 = vmatpush3.bf16.xpose.msk.msra.mxu0 %vm369_vm1, %v260_v3 }
   0x6   :  { %268 = vmatprep.subr.msk.bf16.mxu0 %vm369_vm1, %v266_v6 }
   0x7   :  { %8 = vsyncpa [#allocation3], 0  ;;  %v272_v10 = vpack.c.bf16 %v22_v9, %v21_v8  ;;  %v23_v11 = vld [vmem:[%s468_s1 + $0x30] sm:$0xff]  ;;  %v24_v12 = vld [vmem:[%s468_s1 + $0x38] sm:$0xff] }
   0x8   :  { %v278_v13 = vpack.c.bf16 %v24_v12, %v23_v11  ;;  %v25_v14 = vld [vmem:[%s468_s1 + $0x40] sm:$0xff]  ;;  %v26_v15 = vld [vmem:[%s468_s1 + $0x48] sm:$0xff]  ;;  %v27_v17 = vld [vmem:[%s468_s1 + $0x50] sm:$0xff] }
   0x9   :  { %v284_v16 = vpack.c.bf16 %v26_v15, %v25_v14  ;;  %v28_v18 = vld [vmem:[%s468_s1 + $0x58] sm:$0xff]  ;;  %v29_v20 = vld [vmem:[%s468_s1 + $0x60] sm:$0xff]  ;;  %v30_v21 = vld [vmem:[%s468_s1 + $0x68] sm:$0xff] }
   0xa   :  { %v290_v19 = vpack.c.bf16 %v28_v18, %v27_v17  ;;  %v296_v22 = vpack.c.bf16 %v30_v21, %v29_v20  ;;  %v31_v23 = vld [vmem:[%s468_s1 + $0x70] sm:$0xff]  ;;  %v32_v24 = vld [vmem:[%s468_s1 + $0x78] sm:$0xff]  ;;  %v16_v26 = vld [vmem:[%s467_s0 + $0x8] sm:$0xff]  ;;  %s335_s1 = smov [#allocation2]  }
   0xb   :  { %v302_v25 = vpack.c.bf16 %v32_v24, %v31_v23  ;;  %v188_v27 = vld [vmem:[%s469_s2] ss:$0 sm:$0xff]  ;;  %s177_s23 = sshll.u32 %s335_s1, 4  ;;  %s178_s23 = int_to_ptr.vmem [resolvable:$true] %s177_s23 }
   0xc   :  { %s311_s24 = scalar_lea.vmem %s178_s23, 256  ;;  %p316_p1 = scmp.lt.s32.totalorder %s178_s23, %s178_s23 }
   0xd   :  { %271 = vmatpush3.bf16.xpose.msk.msra.mxu0 %vm369_vm1, %v266_v6  ;;  %p312_p0 = scmp.ne.s32.totalorder %s178_s23, %s311_s24  ;;  %p317_p2 = scmp.lt.s32.totalorder %s311_s24, %s311_s24 }
   0xe   :  { %274 = vmatprep.subr.msk.bf16.mxu0 %vm369_vm1, %v272_v10 }
   0xf   :  { %p318_p3 = por %p317_p2, %p316_p1 }
  0x11   :  { %p319_p4 = pnand %p318_p3, %p312_p0 }
  0x15   :  { %277 = vmatpush3.bf16.xpose.msk.msra.mxu0 %vm369_vm1, %v272_v10 }
  0x16   :  { %280 = vmatprep.subr.msk.bf16.mxu0 %vm369_vm1, %v278_v13 }
  0x1d   :  { %283 = vmatpush3.bf16.xpose.msk.msra.mxu0 %vm369_vm1, %v278_v13 }
  0x1e   :  { %286 = vmatprep.subr.msk.bf16.mxu0 %vm369_vm1, %v284_v16 }
  0x25   :  { %289 = vmatpush3.bf16.xpose.msk.msra.mxu0 %vm369_vm1, %v284_v16 }
  0x26   :  { %292 = vmatprep.subr.msk.bf16.mxu0 %vm369_vm1, %v290_v19 }
  0x2d   :  { %295 = vmatpush3.bf16.xpose.msk.msra.mxu0 %vm369_vm1, %v290_v19 }
  0x2e   :  { %298 = vmatprep.subr.msk.bf16.mxu0 %vm369_vm1, %v296_v22 }
  0x35   :  { %301 = vmatpush3.bf16.xpose.msk.msra.mxu0 %vm369_vm1, %v296_v22 }
  0x36   :  { %304 = vmatprep.subr.msk.bf16.mxu0 %vm369_vm1, %v302_v25 }
  0x3d   :  { %307 = vmatpush3.bf16.xpose.msk.msra.mxu0 %vm369_vm1, %v302_v25 }
  0x44   :  { %258 = vmatmul.mubr.msk.f32.vlgmr.msra.gmra.mrb[0].mxu0 %vm40_vm0, %v16_v26 }
 0x117   :  { %v259_v28 = vpop.f32.mrb[0].mxu0 }
 0x118   :  { %v167_v29 = vadd.f32 %v259_v28, %v188_v27  ;;  %v161_v30 = vpop.f32.mrb[1].mxu0 }
 0x119   :  { %v162_v31 = vadd.f32 %v188_v27, %v161_v30 }
 0x11a   :  { %171 = vst [vmem:[#allocation2 + $0x8] sm:$0xff] %v167_v29 }
 0x11b   :  { %170 = vst [vmem:[#allocation2] sm:$0xff] %v162_v31 }
 0x11c   :  { %322 = shalt.err (!%p319_p4)
}
 0x11d   :  { %s323_s2 = scalar_lea.hbm %s470_s3, 256 }
 0x11e   :  { %p324_p5 = scmp.ne.s32.totalorder %s470_s3, %s323_s2  ;;  %p327_p6 = scmp.lt.u32.totalorder %s323_s2, %s470_s3 }
 0x120   :  { %p329_p7 = pnand %p327_p6, %p324_p5 }
 0x122   :  { %332 = shalt.err (!%p329_p7)
}
 0x123   :  { %s336_s30 = smov 128   ;;  %s337_s4 = smov 8  }
 0x124   :  { %183 = dma.vmem_to_hbm [thread:$0]  %s178_s23, 256, %s470_s3, [#allocation3], %s336_s30, %s336_s30, %s337_s4  }
 0x125   :  { %333 = dma.done.wait [#allocation3], 256  }
 0x126   :  { %334 = vsyncadd [#allocation3], 4294967040 }
 0x127   :  { %187 = vsyncpa [#allocation3], 1 }

</bundles_post_ra>
